<compile_context>
chip_gen: v7x
topology: tpu7x:2x2x1
jax: 0.10.0
libtpu: 0.0.40
codegen_flags: <defaults>
</compile_context>

<pallas_src>
import functools
import math

import jax
import jax.numpy as jnp
from jax.experimental import pallas as pl
from jax.experimental.pallas import tpu as pltpu

_LANE = 128
_MAX_TILE_BYTES = 4 * 1024 * 1024   # per buffer; 3 bufs x 2 (dbl-buffer) x 4MiB = 24MiB
_SMALL_ELEMS = 64 * 1024            # below this, plain XLA fusion already wins
_TARGET_GRID = 8                    # keep >= 8 steps so v7x's 2 TCs both stay busy


def _cdiv(a, b):
    return -(-a // b)


def _round_up(x, m):
    return _cdiv(x, m) * m


def _sublane_granule(itemsize):
    # Sub-32-bit dtypes pack along sublanes: a fully packed vreg tile needs
    # 8 * (4 / itemsize) rows (8 f32, 16 bf16, 32 int8/fp8).
    return 8 * max(1, 4 // itemsize)


def _choose_layout(total, itemsize):
    """Pick (lanes, rows_padded, block_rows) for a lane-dense streaming layout."""
    granule = _sublane_granule(itemsize)
    lanes = _LANE
    for cand in (1024, 512, 256):
        if total >= cand * granule:
            lanes = cand
            break
    rows = _cdiv(total, lanes)
    # Largest row block within the per-buffer VMEM budget (multiple of granule).
    cap_rows = max(granule, (_MAX_TILE_BYTES // (lanes * itemsize)) // granule * granule)
    # But keep at least ~_TARGET_GRID grid steps for pipelining / 2-TC sharding.
    want_rows = _round_up(max(1, _cdiv(rows, _TARGET_GRID)), granule)
    block_rows = max(granule, min(cap_rows, want_rows))
    rows_padded = _round_up(rows, block_rows)
    return lanes, rows_padded, block_rows


def _merge_kernel(lam_ref, h_in_ref, h_out_ref, o_ref):
    """One (block_rows, lanes) tile of: o = lam * h_out + (1 - lam) * h_in."""
    dt = h_out_ref.dtype
    lam = lam_ref[0].astype(dt)            # scalar reads from SMEM
    one_minus_lam = lam_ref[1].astype(dt)
    o_ref[...] = (lam * h_out_ref[...] + one_minus_lam * h_in_ref[...]).astype(o_ref.dtype)


@functools.partial(jax.jit, static_argnames=("force_pallas",))
def merge_layer_forward(h_inbound, h_outbound, lambda_param, *, force_pallas=False):
    """Pallas implementation of MergeLayer.forward."""
    assert h_inbound.shape == h_outbound.shape, "inputs must have equal shapes"
    orig_shape = h_inbound.shape
    out_dtype = jnp.result_type(h_inbound.dtype, h_outbound.dtype)
    # Floating inputs: compute in their own dtype (bf16-native on v6e/v7x,
    # matches PyTorch promotion with a 0-dim f32 parameter). Otherwise f32.
    compute_dtype = out_dtype if jnp.issubdtype(out_dtype, jnp.floating) else jnp.float32
    itemsize = jnp.dtype(compute_dtype).itemsize

    lam_f32 = jnp.asarray(lambda_param, jnp.float32).reshape(())
    total = math.prod(orig_shape)

    if total == 0:
        return jnp.zeros(orig_shape, out_dtype)

    # Tiny inputs: custom-call launch + pipeline prologue dwarfs the work.
    if total < _SMALL_ELEMS and not force_pallas:
        lam = lam_f32.astype(compute_dtype)
        h = lam * h_outbound.astype(compute_dtype) \
            + (1 - lam) * h_inbound.astype(compute_dtype)
        return h.astype(out_dtype)

    lanes, rows_padded, block_rows = _choose_layout(total, itemsize)
    padded_total = rows_padded * lanes

    h_in_flat = h_inbound.reshape(-1).astype(compute_dtype)
    h_out_flat = h_outbound.reshape(-1).astype(compute_dtype)
    if padded_total != total:
        pad = padded_total - total
        h_in_flat = jnp.pad(h_in_flat, (0, pad))
        h_out_flat = jnp.pad(h_out_flat, (0, pad))
    h_in2 = h_in_flat.reshape(rows_padded, lanes)
    h_out2 = h_out_flat.reshape(rows_padded, lanes)

    # Precompute (1 - lam) on the host side of the call; both scalars go to SMEM.
    lam_pair = jnp.stack([lam_f32, 1.0 - lam_f32]).astype(jnp.float32)  # shape (2,)

    grid = (rows_padded // block_rows,)
    tile_spec = pl.BlockSpec((block_rows, lanes), lambda i: (i, 0))

    out2 = pl.pallas_call(
        _merge_kernel,
        out_shape=jax.ShapeDtypeStruct((rows_padded, lanes), compute_dtype),
        grid_spec=pltpu.PrefetchScalarGridSpec(
            num_scalar_prefetch=0,
            grid=grid,
            in_specs=[
                pl.BlockSpec(memory_space=pltpu.MemorySpace.SMEM),  # [lam, 1-lam]
                tile_spec,  # h_inbound tile
                tile_spec,  # h_outbound tile
            ],
            out_specs=tile_spec,
        ),
        compiler_params=pltpu.CompilerParams(
            dimension_semantics=("parallel",),
            vmem_limit_bytes=32 * 1024 * 1024,
        ),
        cost_estimate=pl.CostEstimate(
            flops=3 * padded_total,
            transcendentals=0,
            bytes_accessed=3 * padded_total * itemsize + 8,
        ),
    )(lam_pair, h_in2, h_out2)

    out_flat = out2.reshape(-1)
    if padded_total != total:
        out_flat = out_flat[:total]
    return out_flat.reshape(orig_shape).astype(out_dtype)


if __name__ == "__main__":
    key = jax.random.PRNGKey(0)
    k_in, k_out, k_in2, k_out2 = jax.random.split(key, 4)

    # Matches nn.Parameter(torch.tensor(0.5)) at init.
    lambda_param = jnp.float32(0.5)

    # 1) Small shape consistent with the module: (num_nodes, h_size) embeddings.
    #    force_pallas=True exercises the padded lane-dense kernel path.
    num_nodes, h_size = 8, 32
    h_inbound = jax.random.normal(k_in, (num_nodes, h_size), dtype=jnp.float32)
    h_outbound = jax.random.normal(k_out, (num_nodes, h_size), dtype=jnp.float32)
    out_small = merge_layer_forward(h_inbound, h_outbound, lambda_param,
                                    force_pallas=True)
    out_small = jax.block_until_ready(out_small)
    ref_small = lambda_param * h_outbound + (1.0 - lambda_param) * h_inbound
    assert out_small.shape == (num_nodes, h_size)
    assert jnp.allclose(out_small, ref_small, atol=1e-6, rtol=1e-6), \
        "small-shape mismatch vs reference"

    # 2) Moderately larger shape exercises the multi-step tiled streaming path.
    big_nodes, big_h = 2048, 128
    h_in_big = jax.random.normal(k_in2, (big_nodes, big_h), dtype=jnp.float32)
    h_out_big = jax.random.normal(k_out2, (big_nodes, big_h), dtype=jnp.float32)
    out_big = merge_layer_forward(h_in_big, h_out_big, lambda_param)
    out_big = jax.block_until_ready(out_big)
    ref_big = lambda_param * h_out_big + (1.0 - lambda_param) * h_in_big
    assert out_big.shape == (big_nodes, big_h)
    assert jnp.allclose(out_big, ref_big, atol=1e-6, rtol=1e-6), \
        "large-shape mismatch vs reference"

    print("KERNEL_OK")
</pallas_src>

<mosaic_0001>
module attributes {stable_mosaic.version = 11 : i64} {
  func.func @_merge_kernel(%arg0: i32, %arg1: memref<2xf32, #tpu.memory_space<smem>>, %arg2: memref<8x128xf32, #tpu.memory_space<vmem>>, %arg3: memref<8x128xf32, #tpu.memory_space<vmem>>, %arg4: memref<8x128xf32, #tpu.memory_space<vmem>>) attributes {dimension_semantics = [#tpu.dimension_semantics<parallel>], iteration_bounds = array<i64: 1>, scalar_prefetch = 0 : i64, scratch_operands = 0 : i64, tpu.core_type = #tpu.core_type<tc>, window_params = [{transform_indices = @transform_0, window_bounds = array<i64: 2>}, {transform_indices = @transform_1, window_bounds = array<i64: 8, 128>}, {transform_indices = @transform_2, window_bounds = array<i64: 8, 128>}, {transform_indices = @transform_3, window_bounds = array<i64: 8, 128>}]} {
    %c0 = arith.constant 0 : index
    %0 = memref.load %arg1[%c0] : memref<2xf32, #tpu.memory_space<smem>>
    %c1 = arith.constant 1 : index
    %1 = memref.load %arg1[%c1] : memref<2xf32, #tpu.memory_space<smem>>
    %c0_0 = arith.constant 0 : index
    %c0_1 = arith.constant 0 : index
    %2 = vector.load %arg3[%c0_0, %c0_1] : memref<8x128xf32, #tpu.memory_space<vmem>>, vector<8x128xf32>
    %3 = vector.broadcast %0 : f32 to vector<8x128xf32>
    %4 = arith.mulf %3, %2 : vector<8x128xf32>
    %c0_2 = arith.constant 0 : index
    %c0_3 = arith.constant 0 : index
    %5 = vector.load %arg2[%c0_2, %c0_3] : memref<8x128xf32, #tpu.memory_space<vmem>>, vector<8x128xf32>
    %6 = vector.broadcast %1 : f32 to vector<8x128xf32>
    %7 = arith.mulf %6, %5 : vector<8x128xf32>
    %8 = arith.addf %4, %7 : vector<8x128xf32>
    %c0_4 = arith.constant 0 : index
    %c0_5 = arith.constant 0 : index
    %9 = vector.load %arg4[%c0_4, %c0_5] : memref<8x128xf32, #tpu.memory_space<vmem>>, vector<8x128xf32>
    tpu.vector_store %arg4[%c0_4, %c0_5], %8 {strides = array<i32>} : memref<8x128xf32, #tpu.memory_space<vmem>>, vector<8x128xf32>,
    return
  }
  func.func @transform_0(%arg0: i32) -> i32 {
    %c0_i32 = arith.constant 0 : i32
    %c0_i32_0 = arith.constant 0 : i32
    return %c0_i32 : i32
  }
  func.func @transform_1(%arg0: i32) -> (i32, i32) {
    %c0_i32 = arith.constant 0 : i32
    %c0_i32_0 = arith.constant 0 : i32
    return %arg0, %c0_i32 : i32, i32
  }
  func.func @transform_2(%arg0: i32) -> (i32, i32) {
    %c0_i32 = arith.constant 0 : i32
    %c0_i32_0 = arith.constant 0 : i32
    return %arg0, %c0_i32 : i32, i32
  }
  func.func @transform_3(%arg0: i32) -> (i32, i32) {
    %c0_i32 = arith.constant 0 : i32
    %c0_i32_0 = arith.constant 0 : i32
    return %arg0, %c0_i32 : i32, i32
  }
}

</mosaic_0001>

<bundles_post_ra>
// kernel: merge_layer_forward.1
= control target key start
LH: loop header
LB: loop body
LE: loop exit
PB: predicated region body
PF: predicated region fallthrough
CT: control target
= control target key end

     0   :  { %8 = vsyncpa [#allocation3], 0  ;;  %s91_s0 = inlined_call_operand.vmem [shape: f32[2], index: 0, kind: input, shape index: {}]   ;;  %s92_s1 = inlined_call_operand.vmem [shape: f32[8,128], index: 1, kind: input, shape index: {}]   ;;  %s93_s2 = inlined_call_operand.vmem [shape: f32[8,128], index: 2, kind: input, shape index: {}]   ;;  %s94_s3 = inlined_call_operand.vmem [shape: f32[8,128], index: 3, kind: output, shape index: {}]  }
   0x1   :  { %s15_s14 = sshll.u32 %s91_s0, 4  ;;  %s16_s14 = int_to_ptr.vmem [resolvable:$true] %s15_s14 }
   0x2   :  { %s44_s15 = scalar_lea.vmem %s16_s14, 16  ;;  %p49_p1 = scmp.lt.s32.totalorder %s16_s14, %s16_s14 }
   0x3   :  { %p45_p0 = scmp.ne.s32.totalorder %s16_s14, %s44_s15  ;;  %p50_p2 = scmp.lt.s32.totalorder %s44_s15, %s44_s15 }
   0x5   :  { %p51_p3 = por %p50_p2, %p49_p1 }
   0x7   :  { %p52_p4 = pnand %p51_p3, %p45_p0 }
   0x9   :  { %55 = shalt.err (!%p52_p4)
}
   0xa   :  { %s58_s16 = smov [#allocation2]  }
   0xb   :  { %18 = dma.vmem_to_smem %s16_s14, 16, %s58_s16, [#allocation3]  }
   0xc   :  { %56 = dma.done.wait [#allocation3], 16  }
   0xd   :  { %57 = vsyncadd [#allocation3], 4294967280 }
   0xe   :  { %26 = sfence }
   0xf   :  { %s27_s17 = sld [smem:[#allocation2]]  ;;  %s42_s18 = sld [smem:[#allocation2 + $0x1]]  ;;  %v29_v0 = vld [vmem:[%s93_s2] sm:$0xff] }
  0x10   :  { %v32_v1 = vld [vmem:[%s92_s1] sm:$0xff] }
  0x15   :  { %v30_v2 = vstv %s27_s17  ;;  %v33_v3 = vstv %s42_s18 }
  0x16   :  { %v31_v4 = vmul.f32 %v30_v2, %v29_v0  ;;  %v34_v5 = vmul.f32 %v33_v3, %v32_v1 }
  0x18   :  { %v35_v6 = vadd.f32 %v34_v5, %v31_v4 }
  0x1a   :  { %36 = vst [vmem:[%s94_s3] sm:$0xff] %v35_v6 }
  0x1b   :  { %41 = vsyncpa [#allocation3], 1 }

</bundles_post_ra>
